<compile_context>
chip_gen: v5e
topology: v5e:2x2
jax: 0.10.0
libtpu: 0.0.40
codegen_flags: <defaults>
</compile_context>

<pallas_src>
import functools

import jax
import jax.numpy as jnp
from jax.experimental import pallas as pl
from jax.experimental.pallas import tpu as pltpu

EPS = 1e-5
VMEM_LIMIT = 32 * 1024 * 1024   # safe on v5e (raise from 16 MiB) / v6e / v7x


def _cparams(dim_sem=None):
    return pltpu.CompilerParams(dimension_semantics=dim_sem,
                                vmem_limit_bytes=VMEM_LIMIT)


def _smem_spec():
    return pl.BlockSpec(memory_space=pltpu.MemorySpace.SMEM)


# ----------------------------------------------------------------------------
# Kernels
# ----------------------------------------------------------------------------
def embed_kernel(x_ref, w_ref, b_ref, o_ref):
    # o[b] = x[b] @ W_in + b_in          (bf16 MXU inputs, f32 accumulation)
    o_ref[0] = (jnp.dot(x_ref[0].astype(jnp.bfloat16), w_ref[...],
                        preferred_element_type=jnp.float32)
                + b_ref[...]).astype(o_ref.dtype)


def ln_qkv_kernel(ln_ref, x_ref, w_ref, b_ref, qkv_ref):
    # qkv[b] = LayerNorm1(x[b]) @ Wqkv + bqkv
    x = x_ref[0].astype(jnp.float32)                       # [N, H]
    d = x.shape[-1]
    mean = jnp.mean(x, axis=-1, keepdims=True)
    # torch.var default is unbiased -> divide by (d - 1), eps added under sqrt
    var = jnp.sum((x - mean) ** 2, axis=-1, keepdims=True) / (d - 1)
    xn = ln_ref[0] + ln_ref[1] * (x - mean) * jax.lax.rsqrt(var + EPS)
    qkv_ref[0] = (jnp.dot(xn.astype(jnp.bfloat16), w_ref[...],
                          preferred_element_type=jnp.float32)
                  + b_ref[...]).astype(qkv_ref.dtype)


def attn_mlp_kernel(ln2_ref, qkv_ref, xres_ref, wproj_ref, bproj_ref,
                    w1_ref, b1_ref, w2_ref, b2_ref,
                    scores_ref, xout_ref, *, scale, hd):
    # One batch element, fully fused: multi-head attention (+ scores out),
    # head-merge + projection, residual, LayerNorm2, MLP(GeLU), residual.
    qkv = qkv_ref[...]                                     # [A, N, 3*hd] (bf16)
    q = qkv[..., :hd]                                      # in-kernel q/k/v split
    k = qkv[..., hd:2 * hd]
    v = qkv[..., 2 * hd:]

    # scores = softmax(q k^T * scale) per head (softmax math in f32)
    s = jnp.einsum("and,amd->anm", q, k,
                   preferred_element_type=jnp.float32) * scale
    s = s - jnp.max(s, axis=-1, keepdims=True)
    p = jnp.exp(s)
    p = p / jnp.sum(p, axis=-1, keepdims=True)             # [A, N, N]
    scores_ref[...] = p.astype(scores_ref.dtype)

    # per-head attention output: [A, N, hd]
    o = jnp.einsum("anm,amd->and", p.astype(jnp.bfloat16), v,
                   preferred_element_type=jnp.float32)

    # head-merge permute folded into the projection:
    #   merged[n, a*hd + r] = o[a, n, r]
    #   merged @ Wproj = sum_a o[a] @ Wproj[a*hd:(a+1)*hd, :]
    yh = jnp.einsum("and,adh->anh", o.astype(jnp.bfloat16), wproj_ref[...],
                    preferred_element_type=jnp.float32)    # [A, N, H]
    y = jnp.sum(yh, axis=0) + bproj_ref[...]               # [N, H]

    # residual + LayerNorm2 (scalar affine, unbiased variance -- as in spec)
    x1 = xres_ref[0].astype(jnp.float32) + y
    d = x1.shape[-1]
    mean = jnp.mean(x1, axis=-1, keepdims=True)
    var = jnp.sum((x1 - mean) ** 2, axis=-1, keepdims=True) / (d - 1)
    xln = ln2_ref[0] + ln2_ref[1] * (x1 - mean) * jax.lax.rsqrt(var + EPS)

    # MLP: Linear -> GeLU(x)=x*sigmoid(1.702x) -> Linear, + residual
    # TODO(synk): nn.Dropout (p=0.5) layers are treated as inference-mode identity.
    h1 = jnp.dot(xln.astype(jnp.bfloat16), w1_ref[...],
                 preferred_element_type=jnp.float32) + b1_ref[...]
    h1 = h1 * jax.nn.sigmoid(1.702 * h1)
    h2 = jnp.dot(h1.astype(jnp.bfloat16), w2_ref[...],
                 preferred_element_type=jnp.float32) + b2_ref[...]
    xout_ref[0] = (xln + h2).astype(xout_ref.dtype)


def head_kernel(x_ref, w_ref, b_ref, o_ref):
    # logits = cls_rows @ W_cls + b_cls
    o_ref[...] = (jnp.dot(x_ref[...].astype(jnp.bfloat16), w_ref[...],
                          preferred_element_type=jnp.float32)
                  + b_ref[...]).astype(o_ref.dtype)


# ----------------------------------------------------------------------------
# Wrappers
# ----------------------------------------------------------------------------
def patch_embed(x, w, b):
    B, n, d_in = x.shape
    H = w.shape[1]
    return pl.pallas_call(
        embed_kernel,
        out_shape=jax.ShapeDtypeStruct((B, n, H), jnp.float32),
        grid=(B,),
        in_specs=[
            pl.BlockSpec((1, n, d_in), lambda i: (i, 0, 0)),
            pl.BlockSpec((d_in, H), lambda i: (0, 0)),       # resident weight
            pl.BlockSpec((1, H), lambda i: (0, 0)),
        ],
        out_specs=pl.BlockSpec((1, n, H), lambda i: (i, 0, 0)),
        compiler_params=_cparams(("parallel",)),
    )(x, w.astype(jnp.bfloat16), b.reshape(1, H))


def transformer_block(x, blk, A):
    """x: [B, Np, H] f32 -> (scores [B, A, Np, Np] f32, x_new [B, Np, H] f32)."""
    B, Np, H = x.shape
    hd = H // A
    scale = hd ** -0.5

    # -- fused LayerNorm1 + qkv projection (gridded over batch) --------------
    qkv = pl.pallas_call(
        ln_qkv_kernel,
        out_shape=jax.ShapeDtypeStruct((B, Np, 3 * H), jnp.bfloat16),
        grid=(B,),
        in_specs=[
            _smem_spec(),                                        # LN1 [mu, sigma]
            pl.BlockSpec((1, Np, H), lambda i: (i, 0, 0)),       # x
            pl.BlockSpec((H, 3 * H), lambda i: (0, 0)),          # Wqkv (resident)
            pl.BlockSpec((1, 3 * H), lambda i: (0, 0)),          # bqkv
        ],
        out_specs=pl.BlockSpec((1, Np, 3 * H), lambda i: (i, 0, 0)),
        compiler_params=_cparams(("parallel",)),
    )(blk["ln1"], x, blk["Wqkv"].astype(jnp.bfloat16),
      blk["bqkv"].reshape(1, 3 * H))

    # exact PyTorch quirk: (b, n, 3d).reshape(b, A, n, 3*hd) is a contiguous
    # (free) reinterpretation; fold in the leading merge and consume blockwise.
    qkv_h = qkv.reshape(B * A, Np, 3 * hd)

    # -- fused attention + proj + residual + LN2 + MLP + residual ------------
    scores, x_new = pl.pallas_call(
        functools.partial(attn_mlp_kernel, scale=scale, hd=hd),
        out_shape=(
            jax.ShapeDtypeStruct((B * A, Np, Np), jnp.float32),
            jax.ShapeDtypeStruct((B, Np, H), jnp.float32),
        ),
        grid=(B,),
        in_specs=[
            _smem_spec(),                                        # LN2 [mu, sigma]
            pl.BlockSpec((A, Np, 3 * hd), lambda i: (i, 0, 0)),  # qkv, quirk layout
            pl.BlockSpec((1, Np, H), lambda i: (i, 0, 0)),       # residual input
            pl.BlockSpec((A, hd, H), lambda i: (0, 0, 0)),       # Wproj, per-head split
            pl.BlockSpec((1, H), lambda i: (0, 0)),              # bproj
            pl.BlockSpec((H, 2 * H), lambda i: (0, 0)),          # W1 (resident)
            pl.BlockSpec((1, 2 * H), lambda i: (0, 0)),          # b1
            pl.BlockSpec((2 * H, H), lambda i: (0, 0)),          # W2 (resident)
            pl.BlockSpec((1, H), lambda i: (0, 0)),              # b2
        ],
        out_specs=(
            pl.BlockSpec((A, Np, Np), lambda i: (i, 0, 0)),
            pl.BlockSpec((1, Np, H), lambda i: (i, 0, 0)),
        ),
        compiler_params=_cparams(("parallel",)),
    )(blk["ln2"], qkv_h, x,
      blk["Wproj"].reshape(A, hd, H).astype(jnp.bfloat16),
      blk["bproj"].reshape(1, H),
      blk["W1"].astype(jnp.bfloat16), blk["b1"].reshape(1, 2 * H),
      blk["W2"].astype(jnp.bfloat16), blk["b2"].reshape(1, H))

    return scores.reshape(B, A, Np, Np), x_new


def classifier_head(x, w, b):
    B, H = x.shape
    C = w.shape[1]
    # Tiny (B x num_classes) head: whole-array resident.  Output lane dim
    # (num_classes=10) < 128 is inherent to the model config at this size.
    return pl.pallas_call(
        head_kernel,
        out_shape=jax.ShapeDtypeStruct((B, C), jnp.float32),
        in_specs=[pl.BlockSpec(memory_space=pltpu.MemorySpace.VMEM)] * 3,
        out_specs=pl.BlockSpec(memory_space=pltpu.MemorySpace.VMEM),
        compiler_params=_cparams(),
    )(x, w.astype(jnp.bfloat16), b.reshape(1, C))


# ----------------------------------------------------------------------------
# Parameters (deterministic, synthetic)
# ----------------------------------------------------------------------------
def init_params(key, L, H, A, in_dim, seq, num_classes):
    ks = iter(jax.random.split(key, 4 + 4 * L))

    def dense(k, fi, fo):
        return jax.random.normal(k, (fi, fo), jnp.float32) * (fi ** -0.5)

    params = {
        "W_in": dense(next(ks), in_dim, H),
        "b_in": jnp.zeros((H,), jnp.float32),
        "cls_token": jax.random.normal(next(ks), (1, 1, H), jnp.float32),
        "pe": jax.random.normal(next(ks), (1, seq + 1, H), jnp.float32) * 0.1,
        "W_cls": dense(next(ks), H, num_classes),
        "b_cls": jnp.zeros((num_classes,), jnp.float32),
        "blocks": [],
    }
    for _ in range(L):
        params["blocks"].append({
            "ln1": jnp.array([0.0, 1.0], jnp.float32),   # [mu, sigma]
            "ln2": jnp.array([0.0, 1.0], jnp.float32),
            "Wqkv": dense(next(ks), H, 3 * H),
            "bqkv": jnp.zeros((3 * H,), jnp.float32),
            "Wproj": dense(next(ks), H, H),
            "bproj": jnp.zeros((H,), jnp.float32),
            "W1": dense(next(ks), H, 2 * H),
            "b1": jnp.zeros((2 * H,), jnp.float32),
            "W2": dense(next(ks), 2 * H, H),
            "b2": jnp.zeros((H,), jnp.float32),
        })
    return params


# ----------------------------------------------------------------------------
# Forward pass (mirrors VisionTransformer.forward)
# ----------------------------------------------------------------------------
def vit_forward(params, x, A):
    B, n, _ = x.shape
    H = params["W_in"].shape[1]

    # patch embedding
    h = patch_embed(x, params["W_in"], params["b_in"])          # [B, n, H]

    # cls token + positional embedding (cheap XLA glue)
    cls = jnp.broadcast_to(params["cls_token"], (B, 1, H))
    h = jnp.concatenate([cls, h], axis=1) + params["pe"]        # [B, n+1, H]

    attn_dict = {}
    for i, blk in enumerate(params["blocks"]):
        scores, h = transformer_block(h, blk, A)
        attn_dict[f"t_block_{i}"] = scores

    # x.transpose(0,1)[0] == cls-token row
    logits = classifier_head(h[:, 0, :], params["W_cls"], params["b_cls"])
    return attn_dict, logits


# ----------------------------------------------------------------------------
if __name__ == "__main__":
    L, H, A = 2, 32, 4
    patch_size, seq, num_classes = 4, 4, 10
    in_dim = 3 * patch_size ** 2  # 48
    B = 2

    key = jax.random.PRNGKey(0)
    kp, kx = jax.random.split(key)
    params = init_params(kp, L, H, A, in_dim, seq, num_classes)
    x = jax.random.normal(kx, (B, seq, in_dim), dtype=jnp.float32)

    fwd = jax.jit(functools.partial(vit_forward, A=A))
    attn_dict, logits = fwd(params, x)
    jax.block_until_ready(logits)
    for s in attn_dict.values():
        jax.block_until_ready(s)

    assert logits.shape == (B, num_classes)
    for i in range(L):
        assert attn_dict[f"t_block_{i}"].shape == (B, A, seq + 1, seq + 1)
    print("KERNEL_OK")
</pallas_src>

<mosaic_0001>
module attributes {stable_mosaic.version = 11 : i64} {
  func.func @embed_kernel(%arg0: i32, %arg1: memref<1x4x48xf32, #tpu.memory_space<vmem>>, %arg2: memref<48x32xbf16, #tpu.memory_space<vmem>>, %arg3: memref<1x32xf32, #tpu.memory_space<vmem>>, %arg4: memref<1x4x32xf32, #tpu.memory_space<vmem>>) attributes {dimension_semantics = [#tpu.dimension_semantics<parallel>], iteration_bounds = array<i64: 2>, scalar_prefetch = 0 : i64, scratch_operands = 0 : i64, tpu.core_type = #tpu.core_type<tc>, window_params = [{transform_indices = @transform_0, window_bounds = array<i64: 1, 4, 48>}, {pipeline_mode = #tpu.pipeline_mode<synchronous>, transform_indices = @transform_1, window_bounds = array<i64: 48, 32>}, {pipeline_mode = #tpu.pipeline_mode<synchronous>, transform_indices = @transform_2, window_bounds = array<i64: 1, 32>}, {transform_indices = @transform_3, window_bounds = array<i64: 1, 4, 32>}]} {
    %c0 = arith.constant 0 : index
    %c0_0 = arith.constant 0 : index
    %c0_1 = arith.constant 0 : index
    %0 = vector.load %arg1[%c0, %c0_0, %c0_1] : memref<1x4x48xf32, #tpu.memory_space<vmem>>, vector<1x4x48xf32>
    %1 = vector.shape_cast %0 : vector<1x4x48xf32> to vector<4x48xf32>
    %2 = arith.truncf %1 : vector<4x48xf32> to vector<4x48xbf16>
    %c0_2 = arith.constant 0 : index
    %c0_3 = arith.constant 0 : index
    %3 = vector.load %arg2[%c0_2, %c0_3] : memref<48x32xbf16, #tpu.memory_space<vmem>>, vector<48x32xbf16>
    %cst = arith.constant dense<0.000000e+00> : vector<4x32xf32>
    %4 = tpu.matmul %2, %3, %cst {dimension_numbers = #tpu.dot_dimension_numbers<[1], [0], [0], [1], [0, 0, 1, 1], [], []>} : vector<4x48xbf16>, vector<48x32xbf16>, vector<4x32xf32> -> vector<4x32xf32>
    %c0_4 = arith.constant 0 : index
    %c0_5 = arith.constant 0 : index
    %5 = vector.load %arg3[%c0_4, %c0_5] : memref<1x32xf32, #tpu.memory_space<vmem>>, vector<1x32xf32>
    %6 = vector.broadcast %5 : vector<1x32xf32> to vector<4x32xf32>
    %7 = arith.addf %4, %6 : vector<4x32xf32>
    %c0_6 = arith.constant 0 : index
    %c0_7 = arith.constant 0 : index
    %c0_8 = arith.constant 0 : index
    %8 = vector.load %arg4[%c0_6, %c0_7, %c0_8] : memref<1x4x32xf32, #tpu.memory_space<vmem>>, vector<1x4x32xf32>
    %9 = vector.shape_cast %8 : vector<1x4x32xf32> to vector<4x32xf32>
    %10 = vector.shape_cast %7 : vector<4x32xf32> to vector<1x4x32xf32>
    tpu.vector_store %arg4[%c0_6, %c0_7, %c0_8], %10 {strides = array<i32>} : memref<1x4x32xf32, #tpu.memory_space<vmem>>, vector<1x4x32xf32>,
    return
  }
  func.func @transform_0(%arg0: i32) -> (i32, i32, i32) {
    %c0_i32 = arith.constant 0 : i32
    %c0_i32_0 = arith.constant 0 : i32
    %c0_i32_1 = arith.constant 0 : i32
    return %arg0, %c0_i32, %c0_i32_0 : i32, i32, i32
  }
  func.func @transform_1(%arg0: i32) -> (i32, i32) {
    %c0_i32 = arith.constant 0 : i32
    %c0_i32_0 = arith.constant 0 : i32
    %c0_i32_1 = arith.constant 0 : i32
    return %c0_i32, %c0_i32_0 : i32, i32
  }
  func.func @transform_2(%arg0: i32) -> (i32, i32) {
    %c0_i32 = arith.constant 0 : i32
    %c0_i32_0 = arith.constant 0 : i32
    %c0_i32_1 = arith.constant 0 : i32
    return %c0_i32, %c0_i32_0 : i32, i32
  }
  func.func @transform_3(%arg0: i32) -> (i32, i32, i32) {
    %c0_i32 = arith.constant 0 : i32
    %c0_i32_0 = arith.constant 0 : i32
    %c0_i32_1 = arith.constant 0 : i32
    return %arg0, %c0_i32, %c0_i32_0 : i32, i32, i32
  }
}

module attributes {stable_mosaic.version = 11 : i64} {
  func.func @ln_qkv_kernel(%arg0: i32, %arg1: memref<2xf32, #tpu.memory_space<smem>>, %arg2: memref<1x5x32xf32, #tpu.memory_space<vmem>>, %arg3: memref<32x96xbf16, #tpu.memory_space<vmem>>, %arg4: memref<1x96xf32, #tpu.memory_space<vmem>>, %arg5: memref<1x5x96xbf16, #tpu.memory_space<vmem>>) attributes {dimension_semantics = [#tpu.dimension_semantics<parallel>], iteration_bounds = array<i64: 2>, scalar_prefetch = 0 : i64, scratch_operands = 0 : i64, tpu.core_type = #tpu.core_type<tc>, window_params = [{transform_indices = @transform_0, window_bounds = array<i64: 2>}, {transform_indices = @transform_1, window_bounds = array<i64: 1, 5, 32>}, {pipeline_mode = #tpu.pipeline_mode<synchronous>, transform_indices = @transform_2, window_bounds = array<i64: 32, 96>}, {pipeline_mode = #tpu.pipeline_mode<synchronous>, transform_indices = @transform_3, window_bounds = array<i64: 1, 96>}, {transform_indices = @transform_4, window_bounds = array<i64: 1, 5, 96>}]} {
    %c0 = arith.constant 0 : index
    %c0_0 = arith.constant 0 : index
    %c0_1 = arith.constant 0 : index
    %0 = vector.load %arg2[%c0, %c0_0, %c0_1] : memref<1x5x32xf32, #tpu.memory_space<vmem>>, vector<1x5x32xf32>
    %1 = vector.shape_cast %0 : vector<1x5x32xf32> to vector<5x32xf32>
    %cst = arith.constant dense<0.000000e+00> : vector<5xf32>
    %2 = vector.multi_reduction <add>, %1, %cst [1] : vector<5x32xf32> to vector<5xf32>
    %3 = vector.shape_cast %2 : vector<5xf32> to vector<5x1xf32>
    %cst_2 = arith.constant 3.200000e+01 : f32
    %4 = vector.broadcast %cst_2 : f32 to vector<5x1xf32>
    %5 = arith.divf %3, %4 : vector<5x1xf32>
    %6 = vector.broadcast %5 : vector<5x1xf32> to vector<5x32xf32>
    %7 = arith.subf %1, %6 : vector<5x32xf32>
    %8 = arith.mulf %7, %7 : vector<5x32xf32>
    %cst_3 = arith.constant dense<0.000000e+00> : vector<5xf32>
    %9 = vector.multi_reduction <add>, %8, %cst_3 [1] : vector<5x32xf32> to vector<5xf32>
    %10 = vector.shape_cast %9 : vector<5xf32> to vector<5x1xf32>
    %cst_4 = arith.constant 3.100000e+01 : f32
    %11 = vector.broadcast %cst_4 : f32 to vector<5x1xf32>
    %12 = arith.divf %10, %11 : vector<5x1xf32>
    %c0_5 = arith.constant 0 : index
    %13 = memref.load %arg1[%c0_5] : memref<2xf32, #tpu.memory_space<smem>>
    %c1 = arith.constant 1 : index
    %14 = memref.load %arg1[%c1] : memref<2xf32, #tpu.memory_space<smem>>
    %15 = vector.broadcast %5 : vector<5x1xf32> to vector<5x32xf32>
    %16 = arith.subf %1, %15 : vector<5x32xf32>
    %17 = vector.broadcast %14 : f32 to vector<5x32xf32>
    %18 = arith.mulf %17, %16 : vector<5x32xf32>
    %cst_6 = arith.constant 9.99999974E-6 : f32
    %19 = vector.broadcast %cst_6 : f32 to vector<5x1xf32>
    %20 = arith.addf %12, %19 : vector<5x1xf32>
    %21 = math.rsqrt %20 : vector<5x1xf32>
    %22 = vector.broadcast %21 : vector<5x1xf32> to vector<5x32xf32>
    %23 = arith.mulf %18, %22 : vector<5x32xf32>
    %24 = vector.broadcast %13 : f32 to vector<5x32xf32>
    %25 = arith.addf %24, %23 : vector<5x32xf32>
    %26 = arith.truncf %25 : vector<5x32xf32> to vector<5x32xbf16>
    %c0_7 = arith.constant 0 : index
    %c0_8 = arith.constant 0 : index
    %27 = vector.load %arg3[%c0_7, %c0_8] : memref<32x96xbf16, #tpu.memory_space<vmem>>, vector<32x96xbf16>
    %cst_9 = arith.constant dense<0.000000e+00> : vector<5x96xf32>
    %28 = tpu.matmul %26, %27, %cst_9 {dimension_numbers = #tpu.dot_dimension_numbers<[1], [0], [0], [1], [0, 0, 1, 1], [], []>} : vector<5x32xbf16>, vector<32x96xbf16>, vector<5x96xf32> -> vector<5x96xf32>
    %c0_10 = arith.constant 0 : index
    %c0_11 = arith.constant 0 : index
    %29 = vector.load %arg4[%c0_10, %c0_11] : memref<1x96xf32, #tpu.memory_space<vmem>>, vector<1x96xf32>
    %30 = vector.broadcast %29 : vector<1x96xf32> to vector<5x96xf32>
    %31 = arith.addf %28, %30 : vector<5x96xf32>
    %32 = arith.truncf %31 : vector<5x96xf32> to vector<5x96xbf16>
    %c0_12 = arith.constant 0 : index
    %c0_13 = arith.constant 0 : index
    %c0_14 = arith.constant 0 : index
    %33 = vector.load %arg5[%c0_12, %c0_13, %c0_14] : memref<1x5x96xbf16, #tpu.memory_space<vmem>>, vector<1x5x96xbf16>
    %34 = vector.shape_cast %33 : vector<1x5x96xbf16> to vector<5x96xbf16>
    %35 = vector.shape_cast %32 : vector<5x96xbf16> to vector<1x5x96xbf16>
    tpu.vector_store %arg5[%c0_12, %c0_13, %c0_14], %35 {strides = array<i32>} : memref<1x5x96xbf16, #tpu.memory_space<vmem>>, vector<1x5x96xbf16>,
    return
  }
  func.func @transform_0(%arg0: i32) -> i32 {
    %c0_i32 = arith.constant 0 : i32
    %c0_i32_0 = arith.constant 0 : i32
    return %c0_i32 : i32
  }
  func.func @transform_1(%arg0: i32) -> (i32, i32, i32) {
    %c0_i32 = arith.constant 0 : i32
    %c0_i32_0 = arith.constant 0 : i32
    %c0_i32_1 = arith.constant 0 : i32
    return %arg0, %c0_i32, %c0_i32_0 : i32, i32, i32
  }
  func.func @transform_2(%arg0: i32) -> (i32, i32) {
    %c0_i32 = arith.constant 0 : i32
    %c0_i32_0 = arith.constant 0 : i32
    %c0_i32_1 = arith.constant 0 : i32
    return %c0_i32, %c0_i32_0 : i32, i32
  }
  func.func @transform_3(%arg0: i32) -> (i32, i32) {
    %c0_i32 = arith.constant 0 : i32
    %c0_i32_0 = arith.constant 0 : i32
    %c0_i32_1 = arith.constant 0 : i32
    return %c0_i32, %c0_i32_0 : i32, i32
  }
  func.func @transform_4(%arg0: i32) -> (i32, i32, i32) {
    %c0_i32 = arith.constant 0 : i32
    %c0_i32_0 = arith.constant 0 : i32
    %c0_i32_1 = arith.constant 0 : i32
    return %arg0, %c0_i32, %c0_i32_0 : i32, i32, i32
  }
}

module attributes {stable_mosaic.version = 11 : i64} {
  func.func @attn_mlp_kernel(%arg0: i32, %arg1: memref<2xf32, #tpu.memory_space<smem>>, %arg2: memref<4x5x24xbf16, #tpu.memory_space<vmem>>, %arg3: memref<1x5x32xf32, #tpu.memory_space<vmem>>, %arg4: memref<4x8x32xbf16, #tpu.memory_space<vmem>>, %arg5: memref<1x32xf32, #tpu.memory_space<vmem>>, %arg6: memref<32x64xbf16, #tpu.memory_space<vmem>>, %arg7: memref<1x64xf32, #tpu.memory_space<vmem>>, %arg8: memref<64x32xbf16, #tpu.memory_space<vmem>>, %arg9: memref<1x32xf32, #tpu.memory_space<vmem>>, %arg10: memref<4x5x5xf32, #tpu.memory_space<vmem>>, %arg11: memref<1x5x32xf32, #tpu.memory_space<vmem>>) attributes {dimension_semantics = [#tpu.dimension_semantics<parallel>], iteration_bounds = array<i64: 2>, scalar_prefetch = 0 : i64, scratch_operands = 0 : i64, tpu.core_type = #tpu.core_type<tc>, window_params = [{transform_indices = @transform_0, window_bounds = array<i64: 2>}, {transform_indices = @transform_1, window_bounds = array<i64: 4, 5, 24>}, {transform_indices = @transform_2, window_bounds = array<i64: 1, 5, 32>}, {pipeline_mode = #tpu.pipeline_mode<synchronous>, transform_indices = @transform_3, window_bounds = array<i64: 4, 8, 32>}, {pipeline_mode = #tpu.pipeline_mode<synchronous>, transform_indices = @transform_4, window_bounds = array<i64: 1, 32>}, {pipeline_mode = #tpu.pipeline_mode<synchronous>, transform_indices = @transform_5, window_bounds = array<i64: 32, 64>}, {pipeline_mode = #tpu.pipeline_mode<synchronous>, transform_indices = @transform_6, window_bounds = array<i64: 1, 64>}, {pipeline_mode = #tpu.pipeline_mode<synchronous>, transform_indices = @transform_7, window_bounds = array<i64: 64, 32>}, {pipeline_mode = #tpu.pipeline_mode<synchronous>, transform_indices = @transform_8, window_bounds = array<i64: 1, 32>}, {transform_indices = @transform_9, window_bounds = array<i64: 4, 5, 5>}, {transform_indices = @transform_10, window_bounds = array<i64: 1, 5, 32>}]} {
    %c0 = arith.constant 0 : index
    %c0_0 = arith.constant 0 : index
    %c0_1 = arith.constant 0 : index
    %0 = vector.load %arg2[%c0, %c0_0, %c0_1] : memref<4x5x24xbf16, #tpu.memory_space<vmem>>, vector<4x5x24xbf16>
    %1 = vector.extract_strided_slice %0 {offsets = [0, 0, 0], sizes = [4, 5, 8], strides = [1, 1, 1]} : vector<4x5x24xbf16> to vector<4x5x8xbf16>
    %2 = vector.extract_strided_slice %0 {offsets = [0, 0, 8], sizes = [4, 5, 8], strides = [1, 1, 1]} : vector<4x5x24xbf16> to vector<4x5x8xbf16>
    %3 = vector.extract_strided_slice %0 {offsets = [0, 0, 16], sizes = [4, 5, 8], strides = [1, 1, 1]} : vector<4x5x24xbf16> to vector<4x5x8xbf16>
    "tpu.trace_start"() <{level = 10 : i32, message = "and,amd->anm"}> : () -> ()
    %cst = arith.constant dense<0.000000e+00> : vector<4x5x5xf32>
    %4 = tpu.matmul %1, %2, %cst {dimension_numbers = #tpu.dot_dimension_numbers<[2], [2], [1], [1], [0, 0, 0, 1, 1, 1], [0], [0]>} : vector<4x5x8xbf16>, vector<4x5x8xbf16>, vector<4x5x5xf32> -> vector<4x5x5xf32>
    "tpu.trace_stop"() : () -> ()
    %cst_2 = arith.constant 0.353553385 : f32
    %5 = vector.broadcast %cst_2 : f32 to vector<4x5x5xf32>
    %6 = arith.mulf %4, %5 : vector<4x5x5xf32>
    %cst_3 = arith.constant dense<0xFF800000> : vector<4x5xf32>
    %7 = vector.multi_reduction <maximumf>, %6, %cst_3 [2] : vector<4x5x5xf32> to vector<4x5xf32>
    %8 = vector.shape_cast %7 : vector<4x5xf32> to vector<4x5x1xf32>
    %9 = vector.broadcast %8 : vector<4x5x1xf32> to vector<4x5x5xf32>
    %10 = arith.subf %6, %9 : vector<4x5x5xf32>
    %11 = math.exp %10 : vector<4x5x5xf32>
    %cst_4 = arith.constant dense<0.000000e+00> : vector<4x5xf32>
    %12 = vector.multi_reduction <add>, %11, %cst_4 [2] : vector<4x5x5xf32> to vector<4x5xf32>
    %13 = vector.shape_cast %12 : vector<4x5xf32> to vector<4x5x1xf32>
    %14 = vector.broadcast %13 : vector<4x5x1xf32> to vector<4x5x5xf32>
    %15 = arith.divf %11, %14 : vector<4x5x5xf32>
    %c0_5 = arith.constant 0 : index
    %c0_6 = arith.constant 0 : index
    %c0_7 = arith.constant 0 : index
    %16 = vector.load %arg10[%c0_5, %c0_6, %c0_7] : memref<4x5x5xf32, #tpu.memory_space<vmem>>, vector<4x5x5xf32>
    tpu.vector_store %arg10[%c0_5, %c0_6, %c0_7], %15 {strides = array<i32>} : memref<4x5x5xf32, #tpu.memory_space<vmem>>, vector<4x5x5xf32>,
    %17 = arith.truncf %15 : vector<4x5x5xf32> to vector<4x5x5xbf16>
    "tpu.trace_start"() <{level = 10 : i32, message = "anm,amd->and"}> : () -> ()
    %cst_8 = arith.constant dense<0.000000e+00> : vector<4x5x8xf32>
    %18 = tpu.matmul %17, %3, %cst_8 {dimension_numbers = #tpu.dot_dimension_numbers<[2], [1], [1], [2], [0, 0, 0, 1, 1, 2], [0], [0]>} : vector<4x5x5xbf16>, vector<4x5x8xbf16>, vector<4x5x8xf32> -> vector<4x5x8xf32>
    "tpu.trace_stop"() : () -> ()
    %19 = arith.truncf %18 : vector<4x5x8xf32> to vector<4x5x8xbf16>
    %c0_9 = arith.constant 0 : index
    %c0_10 = arith.constant 0 : index
    %c0_11 = arith.constant 0 : index
    %20 = vector.load %arg4[%c0_9, %c0_10, %c0_11] : memref<4x8x32xbf16, #tpu.memory_space<vmem>>, vector<4x8x32xbf16>
    "tpu.trace_start"() <{level = 10 : i32, message = "and,adh->anh"}> : () -> ()
    %cst_12 = arith.constant dense<0.000000e+00> : vector<4x5x32xf32>
    %21 = tpu.matmul %19, %20, %cst_12 {dimension_numbers = #tpu.dot_dimension_numbers<[2], [1], [1], [2], [0, 0, 0, 1, 1, 2], [0], [0]>} : vector<4x5x8xbf16>, vector<4x8x32xbf16>, vector<4x5x32xf32> -> vector<4x5x32xf32>
    "tpu.trace_stop"() : () -> ()
    %cst_13 = arith.constant dense<0.000000e+00> : vector<5x32xf32>
    %22 = vector.multi_reduction <add>, %21, %cst_13 [0] : vector<4x5x32xf32> to vector<5x32xf32>
    %c0_14 = arith.constant 0 : index
    %c0_15 = arith.constant 0 : index
    %23 = vector.load %arg5[%c0_14, %c0_15] : memref<1x32xf32, #tpu.memory_space<vmem>>, vector<1x32xf32>
    %24 = vector.broadcast %23 : vector<1x32xf32> to vector<5x32xf32>
    %25 = arith.addf %22, %24 : vector<5x32xf32>
    %c0_16 = arith.constant 0 : index
    %c0_17 = arith.constant 0 : index
    %c0_18 = arith.constant 0 : index
    %26 = vector.load %arg3[%c0_16, %c0_17, %c0_18] : memref<1x5x32xf32, #tpu.memory_space<vmem>>, vector<1x5x32xf32>
    %27 = vector.shape_cast %26 : vector<1x5x32xf32> to vector<5x32xf32>
    %28 = arith.addf %27, %25 : vector<5x32xf32>
    %cst_19 = arith.constant dense<0.000000e+00> : vector<5xf32>
    %29 = vector.multi_reduction <add>, %28, %cst_19 [1] : vector<5x32xf32> to vector<5xf32>
    %30 = vector.shape_cast %29 : vector<5xf32> to vector<5x1xf32>
    %cst_20 = arith.constant 3.200000e+01 : f32
    %31 = vector.broadcast %cst_20 : f32 to vector<5x1xf32>
    %32 = arith.divf %30, %31 : vector<5x1xf32>
    %33 = vector.broadcast %32 : vector<5x1xf32> to vector<5x32xf32>
    %34 = arith.subf %28, %33 : vector<5x32xf32>
    %35 = arith.mulf %34, %34 : vector<5x32xf32>
    %cst_21 = arith.constant dense<0.000000e+00> : vector<5xf32>
    %36 = vector.multi_reduction <add>, %35, %cst_21 [1] : vector<5x32xf32> to vector<5xf32>
    %37 = vector.shape_cast %36 : vector<5xf32> to vector<5x1xf32>
    %cst_22 = arith.constant 3.100000e+01 : f32
    %38 = vector.broadcast %cst_22 : f32 to vector<5x1xf32>
    %39 = arith.divf %37, %38 : vector<5x1xf32>
    %c0_23 = arith.constant 0 : index
    %40 = memref.load %arg1[%c0_23] : memref<2xf32, #tpu.memory_space<smem>>
    %c1 = arith.constant 1 : index
    %41 = memref.load %arg1[%c1] : memref<2xf32, #tpu.memory_space<smem>>
    %42 = vector.broadcast %32 : vector<5x1xf32> to vector<5x32xf32>
    %43 = arith.subf %28, %42 : vector<5x32xf32>
    %44 = vector.broadcast %41 : f32 to vector<5x32xf32>
    %45 = arith.mulf %44, %43 : vector<5x32xf32>
    %cst_24 = arith.constant 9.99999974E-6 : f32
    %46 = vector.broadcast %cst_24 : f32 to vector<5x1xf32>
    %47 = arith.addf %39, %46 : vector<5x1xf32>
    %48 = math.rsqrt %47 : vector<5x1xf32>
    %49 = vector.broadcast %48 : vector<5x1xf32> to vector<5x32xf32>
    %50 = arith.mulf %45, %49 : vector<5x32xf32>
    %51 = vector.broadcast %40 : f32 to vector<5x32xf32>
    %52 = arith.addf %51, %50 : vector<5x32xf32>
    %53 = arith.truncf %52 : vector<5x32xf32> to vector<5x32xbf16>
    %c0_25 = arith.constant 0 : index
    %c0_26 = arith.constant 0 : index
    %54 = vector.load %arg6[%c0_25, %c0_26] : memref<32x64xbf16, #tpu.memory_space<vmem>>, vector<32x64xbf16>
    %cst_27 = arith.constant dense<0.000000e+00> : vector<5x64xf32>
    %55 = tpu.matmul %53, %54, %cst_27 {dimension_numbers = #tpu.dot_dimension_numbers<[1], [0], [0], [1], [0, 0, 1, 1], [], []>} : vector<5x32xbf16>, vector<32x64xbf16>, vector<5x64xf32> -> vector<5x64xf32>
    %c0_28 = arith.constant 0 : index
    %c0_29 = arith.constant 0 : index
    %56 = vector.load %arg7[%c0_28, %c0_29] : memref<1x64xf32, #tpu.memory_space<vmem>>, vector<1x64xf32>
    %57 = vector.broadcast %56 : vector<1x64xf32> to vector<5x64xf32>
    %58 = arith.addf %55, %57 : vector<5x64xf32>
    %cst_30 = arith.constant 1.702000e+00 : f32
    %59 = vector.broadcast %cst_30 : f32 to vector<5x64xf32>
    %60 = arith.mulf %59, %58 : vector<5x64xf32>
    %61 = arith.negf %60 : vector<5x64xf32>
    %62 = math.exp %61 : vector<5x64xf32>
    %cst_31 = arith.constant 1.000000e+00 : f32
    %63 = vector.broadcast %cst_31 : f32 to vector<5x64xf32>
    %64 = arith.addf %63, %62 : vector<5x64xf32>
    %65 = arith.divf %63, %64 : vector<5x64xf32>
    %66 = arith.mulf %58, %65 : vector<5x64xf32>
    %67 = arith.truncf %66 : vector<5x64xf32> to vector<5x64xbf16>
    %c0_32 = arith.constant 0 : index
    %c0_33 = arith.constant 0 : index
    %68 = vector.load %arg8[%c0_32, %c0_33] : memref<64x32xbf16, #tpu.memory_space<vmem>>, vector<64x32xbf16>
    %cst_34 = arith.constant dense<0.000000e+00> : vector<5x32xf32>
    %69 = tpu.matmul %67, %68, %cst_34 {dimension_numbers = #tpu.dot_dimension_numbers<[1], [0], [0], [1], [0, 0, 1, 1], [], []>} : vector<5x64xbf16>, vector<64x32xbf16>, vector<5x32xf32> -> vector<5x32xf32>
    %c0_35 = arith.constant 0 : index
    %c0_36 = arith.constant 0 : index
    %70 = vector.load %arg9[%c0_35, %c0_36] : memref<1x32xf32, #tpu.memory_space<vmem>>, vector<1x32xf32>
    %71 = vector.broadcast %70 : vector<1x32xf32> to vector<5x32xf32>
    %72 = arith.addf %69, %71 : vector<5x32xf32>
    %73 = arith.addf %52, %72 : vector<5x32xf32>
    %c0_37 = arith.constant 0 : index
    %c0_38 = arith.constant 0 : index
    %c0_39 = arith.constant 0 : index
    %74 = vector.load %arg11[%c0_37, %c0_38, %c0_39] : memref<1x5x32xf32, #tpu.memory_space<vmem>>, vector<1x5x32xf32>
    %75 = vector.shape_cast %74 : vector<1x5x32xf32> to vector<5x32xf32>
    %76 = vector.shape_cast %73 : vector<5x32xf32> to vector<1x5x32xf32>
    tpu.vector_store %arg11[%c0_37, %c0_38, %c0_39], %76 {strides = array<i32>} : memref<1x5x32xf32, #tpu.memory_space<vmem>>, vector<1x5x32xf32>,
    return
  }
  func.func @transform_0(%arg0: i32) -> i32 {
    %c0_i32 = arith.constant 0 : i32
    %c0_i32_0 = arith.constant 0 : i32
    return %c0_i32 : i32
  }
  func.func @transform_1(%arg0: i32) -> (i32, i32, i32) {
    %c0_i32 = arith.constant 0 : i32
    %c0_i32_0 = arith.constant 0 : i32
    %c0_i32_1 = arith.constant 0 : i32
    return %arg0, %c0_i32, %c0_i32_0 : i32, i32, i32
  }
  func.func @transform_2(%arg0: i32) -> (i32, i32, i32) {
    %c0_i32 = arith.constant 0 : i32
    %c0_i32_0 = arith.constant 0 : i32
    %c0_i32_1 = arith.constant 0 : i32
    return %arg0, %c0_i32, %c0_i32_0 : i32, i32, i32
  }
  func.func @transform_3(%arg0: i32) -> (i32, i32, i32) {
    %c0_i32 = arith.constant 0 : i32
    %c0_i32_0 = arith.constant 0 : i32
    %c0_i32_1 = arith.constant 0 : i32
    %c0_i32_2 = arith.constant 0 : i32
    return %c0_i32, %c0_i32_0, %c0_i32_1 : i32, i32, i32
  }
  func.func @transform_4(%arg0: i32) -> (i32, i32) {
    %c0_i32 = arith.constant 0 : i32
    %c0_i32_0 = arith.constant 0 : i32
    %c0_i32_1 = arith.constant 0 : i32
    return %c0_i32, %c0_i32_0 : i32, i32
  }
  func.func @transform_5(%arg0: i32) -> (i32, i32) {
    %c0_i32 = arith.constant 0 : i32
    %c0_i32_0 = arith.constant 0 : i32
    %c0_i32_1 = arith.constant 0 : i32
    return %c0_i32, %c0_i32_0 : i32, i32
  }
  func.func @transform_6(%arg0: i32) -> (i32, i32) {
    %c0_i32 = arith.constant 0 : i32
    %c0_i32_0 = arith.constant 0 : i32
    %c0_i32_1 = arith.constant 0 : i32
    return %c0_i32, %c0_i32_0 : i32, i32
  }
  func.func @transform_7(%arg0: i32) -> (i32, i32) {
    %c0_i32 = arith.constant 0 : i32
    %c0_i32_0 = arith.constant 0 : i32
    %c0_i32_1 = arith.constant 0 : i32
    return %c0_i32, %c0_i32_0 : i32, i32
  }
  func.func @transform_8(%arg0: i32) -> (i32, i32) {
    %c0_i32 = arith.constant 0 : i32
    %c0_i32_0 = arith.constant 0 : i32
    %c0_i32_1 = arith.constant 0 : i32
    return %c0_i32, %c0_i32_0 : i32, i32
  }
  func.func @transform_9(%arg0: i32) -> (i32, i32, i32) {
    %c0_i32 = arith.constant 0 : i32
    %c0_i32_0 = arith.constant 0 : i32
    %c0_i32_1 = arith.constant 0 : i32
    return %arg0, %c0_i32, %c0_i32_0 : i32, i32, i32
  }
  func.func @transform_10(%arg0: i32) -> (i32, i32, i32) {
    %c0_i32 = arith.constant 0 : i32
    %c0_i32_0 = arith.constant 0 : i32
    %c0_i32_1 = arith.constant 0 : i32
    return %arg0, %c0_i32, %c0_i32_0 : i32, i32, i32
  }
}

module attributes {stable_mosaic.version = 11 : i64} {
  func.func @head_kernel(%arg0: memref<2x32xf32, #tpu.memory_space<vmem>>, %arg1: memref<32x10xbf16, #tpu.memory_space<vmem>>, %arg2: memref<1x10xf32, #tpu.memory_space<vmem>>, %arg3: memref<2x10xf32, #tpu.memory_space<vmem>>) attributes {dimension_semantics = [], scalar_prefetch = 0 : i64, scratch_operands = 0 : i64, tpu.core_type = #tpu.core_type<tc>} {
    %c0 = arith.constant 0 : index
    %c0_0 = arith.constant 0 : index
    %0 = vector.load %arg0[%c0, %c0_0] : memref<2x32xf32, #tpu.memory_space<vmem>>, vector<2x32xf32>
    %1 = arith.truncf %0 : vector<2x32xf32> to vector<2x32xbf16>
    %c0_1 = arith.constant 0 : index
    %c0_2 = arith.constant 0 : index
    %2 = vector.load %arg1[%c0_1, %c0_2] : memref<32x10xbf16, #tpu.memory_space<vmem>>, vector<32x10xbf16>
    %cst = arith.constant dense<0.000000e+00> : vector<2x10xf32>
    %3 = tpu.matmul %1, %2, %cst {dimension_numbers = #tpu.dot_dimension_numbers<[1], [0], [0], [1], [0, 0, 1, 1], [], []>} : vector<2x32xbf16>, vector<32x10xbf16>, vector<2x10xf32> -> vector<2x10xf32>
    %c0_3 = arith.constant 0 : index
    %c0_4 = arith.constant 0 : index
    %4 = vector.load %arg2[%c0_3, %c0_4] : memref<1x10xf32, #tpu.memory_space<vmem>>, vector<1x10xf32>
    %5 = vector.broadcast %4 : vector<1x10xf32> to vector<2x10xf32>
    %6 = arith.addf %3, %5 : vector<2x10xf32>
    %c0_5 = arith.constant 0 : index
    %c0_6 = arith.constant 0 : index
    %7 = vector.load %arg3[%c0_5, %c0_6] : memref<2x10xf32, #tpu.memory_space<vmem>>, vector<2x10xf32>
    tpu.vector_store %arg3[%c0_5, %c0_6], %6 {strides = array<i32>} : memref<2x10xf32, #tpu.memory_space<vmem>>, vector<2x10xf32>,
    return
  }
}

</mosaic_0001>

<bundles_post_ra>
// kernel: vit_forward.6
= control target key start
LH: loop header
LB: loop body
LE: loop exit
PB: predicated region body
PF: predicated region fallthrough
CT: control target
= control target key end

     0   :  { %s331_s12 = smov 0   ;;  %s360_s0 = inlined_call_operand.vmem [shape: f32[2,4,48], index: 0, kind: input, shape index: {}]   ;;  %s361_s1 = inlined_call_operand.vmem [shape: bf16[48,32], index: 1, kind: input, shape index: {}]   ;;  %s362_s2 = inlined_call_operand.vmem [shape: f32[1,32], index: 2, kind: input, shape index: {}]   ;;  %s363_s3 = inlined_call_operand.vmem [shape: f32[2,4,32], index: 3, kind: output, shape index: {}]  }
   0x1 LB: > { %s269_s13 = sadd.s32 4294967295, %s309_s12   ;;  %p273_p0 = scmp.ge.s32.totalorder %s309_s12, 1  ;;  %s309_s12 = sphi %s331_s12, %s13_s12  }
   0x2   : > { %p136_p1 = scmp.lt.s32.totalorder %s309_s12, 3 }
   0x4   : > { %p137_p2 = pnand %p273_p0, %p136_p1 }
   0x5   : > { %p158_p3 = scmp.lt.s32.totalorder (!%p137_p2), %s269_s13, 1 }
   0x6   : > { %140 = sbr.rel (%p137_p2) target bundleno = 157 (0x9d), region = 32 }
   0xb   : > { %v293_v0 = vld [vmem:[%s361_s1 + $0x10] sm:$0xff]  ;;  %v292_v1 = vld [vmem:[%s361_s1 + $0x8] sm:$0xff]  ;;  %s365_s13 = smov (!%p158_p3, %s269_s13), 1  ;;  %v291_v2 = vld [vmem:[%s361_s1] sm:$0xff]  ;;  %vm197_vm0 = vcmask 392192   ;;  %vm214_vm1 = vcmask 257024  }
   0xc   : > { %206 = vmatpush.bf16.msra.mxu0 %v293_v0  ;;  %s274_s18 = sshll.u32 %s365_s13, 2  ;;  %v302_v5 = vld [vmem:[%s362_s2] ss:$0 sm:$0xff] }
   0xd   : > { %s161_s21 = scalar_lea.vmem %s360_s0, %s274_s18  ;;  %s165_s28 = scalar_lea.vmem %s363_s3, %s274_s18 }
   0xe   : > { %v167_v3 = vld [vmem:[%s161_s21] sm:$0xf] }
   0xf   : > { %v168_v4 = vpack.c.bf16 %v167_v3, %v167_v3 }
  0x10   : > { %207 = vmatpush.bf16.msra.mxu0 %v292_v1 }
  0x14   : > { %208 = vmatpush.bf16.msra.mxu0 %v291_v2 }
  0x17   : > { %288 = vmatmul.msk.bf16.vlgmr.msra.gmra.mxu0 %vm197_vm0, %v168_v4 }
  0x94   : > { %v210_v6 = vpop.f32.mrf.mxu0 }
  0x95   : > { %v211_v7 = vadd.f32 %v302_v5, %v210_v6 }
  0x97   : > { %215 = vst.msk [vmem:[%s165_s28] sm:$0xf] %vm214_vm1, %v211_v7 }
  0x9c   : > { %v212_v8 = vpop.f32.mrf.mxu0 }
  0x9d PF: > { %s13_s12 = sadd.s32 1, %s309_s12  }
  0x9e   : > { %p10_p4 = scmp.ge.s32.totalorder %s13_s12, 4  }
  0xa0   :  { %12 = sbr.rel (!%p10_p4) target bundleno = 1 (0x1), region = 62 }

// kernel: vit_forward.7
= control target key start
LH: loop header
LB: loop body
LE: loop exit
PB: predicated region body
PF: predicated region fallthrough
CT: control target
= control target key end

     0   :  { %9 = vsyncpa [#allocation3], 0  ;;  %s468_s15 = smov 0   ;;  %s503_s0 = inlined_call_operand.vmem [shape: f32[2], index: 0, kind: input, shape index: {}]   ;;  %s504_s1 = inlined_call_operand.vmem [shape: f32[2,5,32], index: 1, kind: input, shape index: {}]   ;;  %s505_s2 = inlined_call_operand.vmem [shape: bf16[32,96], index: 2, kind: input, shape index: {}]   ;;  %s506_s3 = inlined_call_operand.vmem [shape: f32[1,96], index: 3, kind: input, shape index: {}]   ;;  %s507_s4 = inlined_call_operand.vmem [shape: bf16[2,5,96], index: 4, kind: output, shape index: {}]  }
   0x1 LB: > { %s362_s16 = sadd.s32 4294967295, %s438_s15   ;;  %p364_p0 = scmp.ge.s32.totalorder %s438_s15, 1  ;;  %s438_s15 = sphi %s468_s15, %s15_s15  }
   0x2   : > { %p135_p1 = scmp.lt.s32.totalorder %s438_s15, 3  ;;  %s147_s19 = sshll.u32 %s503_s0, 4  ;;  %s148_s19 = int_to_ptr.vmem [resolvable:$true] %s147_s19 }
   0x3   : > { %p393_p3 = scmp.eq.s32.totalorder %s362_s16, 0  ;;  %s440_s20 = smov [#allocation2]  }
   0x4   : > { %p136_p2 = pnand %p364_p0, %p135_p1 }
   0x6   : > { %p389_p4 = pneg %p136_p2  ;;  %173 = sbr.rel (%p136_p2) target bundleno = 422 (0x1a6), region = 36 }
   0x8   : > { %p390_p5 = pnand %p393_p3, %p389_p4 }
   0xa   : > { %392 = dma.vmem_to_smem (!%p390_p5), %s148_s19, 16, %s440_s20, [#allocation3]  }
   0xb   : > { %433 = dma.done.wait (%p393_p3), [#allocation3], 16  }
   0xc   : > { %435 = vsyncadd (%p393_p3), [#allocation3], 4294967280 }
   0xd   : > { %180 = sfence }
   0xe   : > { %p199_p6 = scmp.lt.s32.totalorder %s362_s16, 1  ;;  %vm209_vm0 = vcmask 258048   ;;  %v441_v2 = vmov 32.0   ;;  %v442_v14 = vmov 31.0   ;;  %v384_v18 = vld [vmem:[%s505_s2 + $0x8] sm:$0xff]  ;;  %v383_v20 = vld [vmem:[%s505_s2] sm:$0xff] }
   0xf   : > { %407 = vrcp.f32 %v441_v2  ;;  %283 = vmatpush.bf16.msra.mxu0 %v384_v18  ;;  %s371_s29 = sld [smem:[#allocation2 + $0x1]]  ;;  %vm273_vm6 = vcmask 261120   ;;  %v406_v39 = vld [vmem:[%s506_s3] ss:$0 sm:$0xff]  ;;  %vm291_vm7 = vcmask 780288  }
  0x10   : > { %s509_s16 = smov (!%p199_p6, %s362_s16), 1  ;;  %409 = vrcp.f32 %v442_v14  ;;  %s234_s30 = sld [smem:[#allocation2]]  ;;  %vm292_vm8 = vsmask.f32 2304 }
  0x11   : > { %s369_s21 = sshll.u32 %s509_s16, 3  ;;  %s370_s5 = sshll.u32 %s509_s16, 2  ;;  %vm293_vm9 = vmand %vm291_vm7, %vm292_vm8 }
  0x12   : > { %s202_s24 = scalar_lea.vmem %s504_s1, %s369_s21  ;;  %s206_s10 = scalar_lea.vmem %s507_s4, %s370_s5 }
  0x13   : > { %v208_v0 = vld [vmem:[%s202_s24] sm:$0x1f]  ;;  %284 = vmatpush.bf16.msra.mxu0 %v383_v20 }
  0x14   : > { %v210_v1 = vsel %vm209_vm0, %v208_v0, 0.0  ;;  %v294_v42 = vld [vmem:[%s206_s10] sm:$0x7] }
  0x15   : > { %211 = vadd.xlane.f32.xlu0 %v210_v1  ;;  %v408_v3 = vpop.eup %407  ;;  %v236_v30 = vstv %s371_s29 }
  0x16   : > { %v214_v4 = vmul.f32 32.0, %v408_v3  ;;  %vm218_vm1 = vweird.f32 %v408_v3  ;;  %v410_v15 = vpop.eup %409  ;;  %v250_v35 = vstv %s234_s30 }
  0x17   : > { %v227_v16 = vmul.f32 31.0, %v410_v15  ;;  %vm231_vm2 = vweird.f32 %v410_v15 }
  0x18   : > { %v215_v5 = vsub.f32 1.0, %v214_v4 }
  0x19   : > { %v228_v17 = vsub.f32 1.0, %v227_v16 }
  0x1a   : > { %v216_v6 = vmul.f32 %v408_v3, %v215_v5 }
  0x1b   : > { %v229_v19 = vmul.f32 %v410_v15, %v228_v17 }
  0x1c   : > { %v217_v7 = vadd.f32 %v408_v3, %v216_v6 }
  0x1d   : > { %v230_v21 = vadd.f32 %v410_v15, %v229_v19 }
  0x1e   : > { %v219_v8 = vsel %vm218_vm1, %v408_v3, %v217_v7 }
  0x1f   : > { %v232_v22 = vsel %vm231_vm2, %v410_v15, %v230_v21 }
  0x88   : > { %v212_v9 = vpop.xlane.xlu0 %211 }
  0x89   : > { %v220_v10 = vmul.f32 %v219_v8, %v212_v9 }
  0x8b   : > { %v221_v11 = vsub.f32 %v208_v0, %v220_v10 }
  0x8d   : > { %v222_v12 = vmul.f32 %v221_v11, %v221_v11  ;;  %v237_v33 = vmul.f32 %v236_v30, %v221_v11 }
  0x8f   : > { %v223_v13 = vsel %vm209_vm0, %v222_v12, 0.0 }
  0x90   : > { %224 = vadd.xlane.f32.xlu0 %v223_v13 }
 0x103   : > { %v225_v23 = vpop.xlane.xlu0 %224 }
 0x104   : > { %v233_v24 = vmul.f32 %v232_v22, %v225_v23 }
 0x106   : > { %v238_v25 = vadd.f32 1e-05, %v233_v24 }
 0x108   : > { %411 = vrsqrt.f32 %v238_v25  ;;  %vm245_vm4 = vweird.f32 %v238_v25 }
 0x10e   : > { %v412_v26 = vpop.eup %411 }
 0x10f   : > { %v240_v27 = vmul.f32 %v412_v26, %v238_v25  ;;  %vm246_vm3 = vweird.f32 %v412_v26 }
 0x110   : > { %vm247_vm5 = vmor %vm245_vm4, %vm246_vm3 }
 0x111   : > { %v241_v28 = vmul.f32 %v412_v26, %v240_v27 }
 0x113   : > { %v242_v29 = vmul.f32 0.5, %v241_v28 }
 0x115   : > { %v243_v31 = vsub.f32 1.5, %v242_v29 }
 0x117   : > { %v244_v32 = vmul.f32 %v412_v26, %v243_v31 }
 0x119   : > { %v248_v34 = vsel %vm247_vm5, %v412_v26, %v244_v32 }
 0x11a   : > { %v249_v36 = vmul.f32 %v248_v34, %v237_v33 }
 0x11c   : > { %v251_v37 = vadd.f32 %v250_v35, %v249_v36 }
 0x11e   : > { %v252_v38 = vpack.c.bf16 %v251_v37, %v251_v37 }
 0x120   : > { %380 = vmatmul.msk.bf16.vlgmr.msra.gmra.mxu0 %vm273_vm6, %v252_v38 }
 0x19d   : > { %v286_v40 = vpop.f32.mrf.mxu0 }
 0x19e   : > { %v287_v41 = vadd.f32 %v406_v39, %v286_v40 }
 0x1a0   : > { %v290_v43 = vpack.c.bf16 %v287_v41, %v287_v41 }
 0x1a2   : > { %v295_v44 = vsel %vm293_vm9, %v290_v43, %v294_v42 }
 0x1a3   : > { %296 = vst [vmem:[%s206_s10] sm:$0x7] %v295_v44 }
 0x1a5   : > { %v288_v45 = vpop.f32.mrf.mxu0 }
 0x1a6 PF: > { %s15_s15 = sadd.s32 1, %s438_s15  }
 0x1a7   : > { %p12_p7 = scmp.ge.s32.totalorder %s15_s15, 4  }
 0x1a9   :  { %14 = sbr.rel (!%p12_p7) target bundleno = 1 (0x1), region = 71 }
 0x1ae   :  { %316 = vsyncpa [#allocation3], 1 }
 0x1af   :  { %318 = vsyncpa [#allocation3 + $0x1], 1 }

// kernel: vit_forward.11
= control target key start
LH: loop header
LB: loop body
LE: loop exit
PB: predicated region body
PF: predicated region fallthrough
CT: control target
= control target key end

     0   :  { %s148_s0 = inlined_call_operand.vmem [shape: f32[2,32], index: 0, kind: input, shape index: {}]   ;;  %s149_s1 = inlined_call_operand.vmem [shape: bf16[32,10], index: 1, kind: input, shape index: {}]   ;;  %s150_s2 = inlined_call_operand.vmem [shape: f32[1,10], index: 2, kind: input, shape index: {}]   ;;  %s151_s3 = inlined_call_operand.hbm [shape: f32[2,10], index: 3, kind: output, shape index: {}]  }
   0x1   :  { %v83_v0 = vld [vmem:[%s149_s1 + $0x8] sm:$0xff] }
   0x2   :  { %8 = vsyncpa [#allocation3], 0  ;;  %48 = vmatpush.bf16.msra.mxu0 %v83_v0  ;;  %v82_v1 = vld [vmem:[%s149_s1] sm:$0xff]  ;;  %vm38_vm0 = vcmask 261120   ;;  %s112_s20 = smov [#allocation2]   ;;  %s64_s24 = sshll.u32 %s151_s3, 4  ;;  %s65_s24 = int_to_ptr.hbm [resolvable:$true] %s64_s24 }
   0x3   :  { %v16_v2 = vld [vmem:[%s148_s0] sm:$0x3]  ;;  %s62_s21 = sshll.u32 %s112_s20, 4  ;;  %vm55_vm1 = vcmask 74752   ;;  %s63_s21 = int_to_ptr.vmem [resolvable:$true] %s62_s21 }
   0x4   :  { %v17_v3 = vpack.c.bf16 %v16_v2, %v16_v2  ;;  %v85_v4 = vld [vmem:[%s150_s2] ss:$0 sm:$0xff] }
   0x6   :  { %49 = vmatpush.bf16.msra.mxu0 %v82_v1 }
   0x9   :  { %81 = vmatmul.msk.bf16.vlgmr.msra.gmra.mxu0 %vm38_vm0, %v17_v3 }
  0x86   :  { %v51_v5 = vpop.f32.mrf.mxu0 }
  0x87   :  { %v52_v6 = vadd.f32 %v85_v4, %v51_v5 }
  0x89   :  { %56 = vst.msk [vmem:[#allocation2] sm:$0x3] %vm55_vm1, %v52_v6 }
  0x8a   :  { %67 = dma.vmem_to_hbm [thread:$0]  %s63_s21, 32, %s65_s24, [#allocation3]  }
  0x8e   :  { %v53_v7 = vpop.f32.mrf.mxu0 }
  0x8f   :  { %110 = dma.done.wait [#allocation3], 32  }
  0x90   :  { %111 = vsyncadd [#allocation3], 4294967264 }
  0x91   :  { %72 = vsyncpa [#allocation3], 1 }

// kernel: vit_forward.8
= control target key start
LH: loop header
LB: loop body
LE: loop exit
PB: predicated region body
PF: predicated region fallthrough
CT: control target
= control target key end

     0   :  { %16 = vsyncpa [#allocation3], 0  ;;  %s1275_s13 = smov 0   ;;  %s1424_s0 = inlined_call_operand.vmem [shape: f32[2], index: 0, kind: input, shape index: {}]   ;;  %s1425_s1 = inlined_call_operand.vmem [shape: bf16[8,5,24], index: 1, kind: input, shape index: {}]   ;;  %s1426_s2 = inlined_call_operand.vmem [shape: f32[2,5,32], index: 2, kind: input, shape index: {}]   ;;  %s1427_s3 = inlined_call_operand.vmem [shape: bf16[4,8,32], index: 3, kind: input, shape index: {}]   ;;  %s1428_s4 = inlined_call_operand.vmem [shape: f32[1,32], index: 4, kind: input, shape index: {}]   ;;  %s1429_s5 = inlined_call_operand.vmem [shape: bf16[32,64], index: 5, kind: input, shape index: {}]   ;;  %s1430_s6 = inlined_call_operand.vmem [shape: f32[1,64], index: 6, kind: input, shape index: {}]   ;;  %s1431_s7 = inlined_call_operand.vmem [shape: bf16[64,32], index: 7, kind: input, shape index: {}]   ;;  %s1432_s8 = inlined_call_operand.vmem [shape: f32[1,32], index: 8, kind: input, shape index: {}]   ;;  %s1433_s9 = inlined_call_operand.vmem [shape: f32[8,5,5], index: 9, kind: output, shape index: {0}]   ;;  %s1434_s10 = inlined_call_operand.vmem [shape: f32[2,5,32], index: 10, kind: output, shape index: {1}]  }
   0x1 LB: > { %s1281_s14 = sadd.s32 4294967295, %s1212_s13   ;;  %p1075_p0 = scmp.ge.s32.totalorder %s1212_s13, 1  ;;  %s1212_s13 = sphi %s1275_s13, %s22_s13  }
   0x2   : > { %p278_p1 = scmp.lt.s32.totalorder %s1212_s13, 3  ;;  %s290_s17 = sshll.u32 %s1424_s0, 4  ;;  %s291_s17 = int_to_ptr.vmem [resolvable:$true] %s290_s17 }
   0x3   : > { %p1142_p3 = scmp.eq.s32.totalorder %s1281_s14, 0  ;;  %s1214_s18 = smov [#allocation2]  }
   0x4   : > { %p279_p2 = pnand %p1075_p0, %p278_p1 }
   0x6   : > { %p1138_p4 = pneg %p279_p2  ;;  %337 = sbr.rel (%p279_p2) target bundleno = 1403 (0x57b), region = 56 }
   0x8   : > { %p1139_p5 = pnand %p1142_p3, %p1138_p4 }
   0xa   : > { %1141 = dma.vmem_to_smem (!%p1139_p5), %s291_s17, 16, %s1214_s18, [#allocation3]  }
   0xb   : > { %1207 = dma.done.wait (%p1142_p3), [#allocation3], 16  }
   0xc   : > { %1209 = vsyncadd (%p1142_p3), [#allocation3], 4294967280 }
   0xd   : > { %344 = sfence }
   0xe   : > { %s1080_s19 = sshll.u32 %s1281_s14, 2  ;;  %s1215_s24 = smov 120   ;;  %vm415_vm0 = vcmask 64512   ;;  %vm511_vm1 = vcmask 36864   ;;  %vm622_vm2 = vcmask 1041408   ;;  %vm623_vm3 = vcmask 1042432  }
   0xf   : > { %p386_p6 = scmp.lt.s32.totalorder %s1080_s19, 7  ;;  %s1216_s25 = smov 112   ;;  %v1217_v48 = vmov 65535   ;;  %vm618_vm9 = vcmask 39936  }
  0x10   : > { %v624_v49 = vsel %vm622_vm2, 4294967295, %v1217_v48  ;;  %p391_p7 = scmp.lt.s32.totalorder %s1281_s14, 1  ;;  %s1098_s30 = sld [smem:[#allocation2 + $0x1]] }
  0x11   : > { %s1436_s19 = smov (!%p386_p6, %s1080_s19), 7  ;;  %v1319_v53 = vsel %vm623_vm3, %v624_v49, 0  ;;  %s829_s11 = sld [smem:[#allocation2]] }
  0x12   : > { %s1081_s20 = sshll.u32 %s1436_s19, 2  ;;  %s1084_s26 = sshll.u32 %s1436_s19, 3 }
  0x13   : > { %s389_s23 = scalar_lea.vmem %s1425_s1, %s1081_s20  ;;  %s1338_s29 = scalar_lea.vmem %s1433_s9, %s1084_s26 }
  0x14   : > { %v408_v0 = vld [vmem:[%s389_s23 + $0x8] sm:$0x7]  ;;  %v406_v1 = vld [vmem:[%s389_s23] sm:$0x7]  ;;  %v409_v4 = vld [vmem:[%s389_s23 + $0xc] sm:$0x7] }
  0x15   : > { %v460_v2 = vunpack.c.l.b16 %v408_v0  ;;  %v411_v3 = vunpack.c.l.b16 %v406_v1  ;;  %v407_v5 = vld [vmem:[%s389_s23 + $0x4] sm:$0x7]  ;;  %v484_v8 = vunpack.c.l.b16 %v409_v4  ;;  %s1438_s14 = smov (!%p391_p7, %s1281_s14), 1 }
  0x16   : > { %v436_v9 = vunpack.c.l.b16 %v407_v5  ;;  %s1082_s20 = sshll.u32 %s1438_s14, 3 }
  0x17   : > { %v461_v6 = vpack.c.b16 %v460_v2, %v460_v2  ;;  %v412_v7 = vpack.c.b16 %v411_v3, %v411_v3  ;;  %v485_v10 = vpack.c.b16 %v484_v8, %v484_v8 }
  0x18   : > { %v1296_v11 = vpack.c.b16 %v436_v9, %v436_v9 }
  0x19   : > { %462 = vrot.lane.b32.xlu0 %v461_v6, %s1215_s24  ;;  %413 = vrot.lane.b32.xlu1 %v412_v7, %s1215_s24 }
  0x21   : > { %486 = vrot.lane.b32.xlu0 %v485_v10, %s1215_s24  ;;  %438 = vrot.lane.b32.xlu1 %v1296_v11, %s1215_s24 }
  0x8b   : > { %v463_v12 = vpop.permute.xlu0 %462  ;;  %v414_v13 = vpop.permute.xlu1 %413 }
  0x8c   : > { %v420_v14 = vsel %vm415_vm0, %v414_v13, 0  ;;  %v468_v15 = vsel %vm415_vm0, %v463_v12, 0 }
  0x8d   : > { %429 = vmatpush.bf16.xpose.msra.mxu0 %v420_v14  ;;  %477 = vmatpush.bf16.xpose.msra.mxu2 %v468_v15 }
  0x93   : > { %v487_v16 = vpop.permute.xlu0 %486  ;;  %v439_v17 = vpop.permute.xlu1 %438 }
  0x94   : > { %1086 = vmatmul.msk.bf16.vlgmr.msra.gmra.mxu0 %vm415_vm0, %v406_v1  ;;  %1088 = vmatmul.msk.bf16.vlgmr.msra.gmra.mxu2 %vm415_vm0, %v408_v0  ;;  %v444_v18 = vsel %vm415_vm0, %v439_v17, 0  ;;  %v492_v19 = vsel %vm415_vm0, %v487_v16, 0 }
  0x95   : > { %453 = vmatpush.bf16.xpose.msra.mxu1 %v444_v18  ;;  %501 = vmatpush.bf16.xpose.msra.mxu3 %v492_v19 }
  0x9c   : > { %1087 = vmatmul.msk.bf16.vlgmr.msra.gmra.mxu1 %vm415_vm0, %v407_v5  ;;  %1089 = vmatmul.msk.bf16.vlgmr.msra.gmra.mxu3 %vm415_vm0, %v409_v4 }
 0x111   : > { %v431_v20 = vpop.f32.mrf.mxu0 }
 0x112   : > { %v507_v21 = vmul.f32 0.35355338, %v431_v20 }
 0x114   : > { %v512_v22 = vsel %vm511_vm1, %v507_v21, -inf }
 0x115   : > { %513 = vmax.xlane.f32.xlu0 %v512_v22 }
 0x117   : > { %v479_v23 = vpop.f32.mrf.mxu2 }
 0x118   : > { %v509_v24 = vmul.f32 0.35355338, %v479_v23 }
 0x119   : > { %v433_v25 = vpop.f32.mrf.mxu0  ;;  %v455_v26 = vpop.f32.mrf.mxu1 }
 0x11a   : > { %v508_v27 = vmul.f32 0.35355338, %v455_v26  ;;  %v518_v28 = vsel %vm511_vm1, %v509_v24, -inf }
 0x11b   : > { %519 = vmax.xlane.f32.xlu2 %v518_v28 }
 0x11c   : > { %v515_v29 = vsel %vm511_vm1, %v508_v27, -inf }
 0x11d   : > { %516 = vmax.xlane.f32.xlu1 %v515_v29 }
 0x11f   : > { %v503_v30 = vpop.f32.mrf.mxu3  ;;  %v481_v31 = vpop.f32.mrf.mxu2 }
 0x120   : > { %v510_v32 = vmul.f32 0.35355338, %v503_v30 }
 0x121   : > { %v457_v33 = vpop.f32.mrf.mxu1 }
 0x122   : > { %v521_v34 = vsel %vm511_vm1, %v510_v32, -inf }
 0x123   : > { %522 = vmax.xlane.f32.xlu2 %v521_v34 }
 0x127   : > { %v505_v35 = vpop.f32.mrf.mxu3 }
 0x129   : > { %684 = vrot.lane.b32.xlu0 %v485_v10, %s1216_s25 }
 0x136   : > { %616 = vrot.lane.b32.xlu1 %v412_v7, %s1216_s25 }
 0x13b   : > { %663 = vrot.lane.b32.xlu2 %v461_v6, %s1216_s25 }
 0x188   : > { %v514_v36 = vpop.xlane.xlu0 %513 }
 0x189   : > { %v524_v37 = vsub.f32 %v507_v21, %v514_v36 }
 0x18b   : > { %v528_v38 = vmul.f32 1.442695, %v524_v37 }
 0x18d   : > { %1161 = vpow2.f32 %v528_v38 }
 0x18e   : > { %v520_v39 = vpop.xlane.xlu2 %519 }
 0x18f   : > { %v526_v43 = vsub.f32 %v509_v24, %v520_v39 }
 0x190   : > { %v517_v40 = vpop.xlane.xlu1 %516 }
 0x191   : > { %v525_v41 = vsub.f32 %v508_v27, %v517_v40  ;;  %v532_v47 = vmul.f32 1.442695, %v526_v43 }
 0x193   : > { %v1162_v42 = vpop.eup %1161  ;;  %v530_v44 = vmul.f32 1.442695, %v525_v41 }
 0x194   : > { %v536_v45 = vsel %vm511_vm1, %v1162_v42, 0.0 }
 0x195   : > { %1163 = vpow2.f32 %v530_v44  ;;  %537 = vadd.xlane.f32.xlu2 %v536_v45 }
 0x196   : > { %v523_v46 = vpop.xlane.xlu2 %522  ;;  %1165 = vpow2.f32 %v532_v47 }
 0x197   : > { %v527_v51 = vsub.f32 %v510_v32, %v523_v46 }
 0x199   : > { %v534_v55 = vmul.f32 1.442695, %v527_v51 }
 0x19b   : > { %v1315_v50 = vpop.eup %1163  ;;  %1167 = vpow2.f32 %v534_v55  ;;  %v685_v3 = vpop.permute.xlu0 %684  ;;  %v709_v55 = vld [vmem:[%s1427_s3] sm:$0xf] }
 0x19c   : > { %v539_v52 = vsel %vm511_vm1, %v1315_v50, 0.0  ;;  %v1322_v57 = vpop.eup %1165  ;;  %v690_v5 = vand.u32 %v685_v3, %v1319_v53 }
 0x19d   : > { %540 = vadd.xlane.f32.xlu2 %v539_v52  ;;  %v542_v58 = vsel %vm511_vm1, %v1322_v57, 0.0 }
 0x19e   : > { %v664_v54 = vpop.permute.xlu2 %663  ;;  %699 = vmatpush.bf16.msrb.mxu3 %v690_v5 }
 0x19f   : > { %v669_v56 = vand.u32 %v664_v54, %v1319_v53 }
 0x1a1   : > { %678 = vmatpush.bf16.msrb.mxu2 %v669_v56  ;;  %v1326_v59 = vpop.eup %1167 }
 0x1a2   : > { %v545_v60 = vsel %vm511_vm1, %v1326_v59, 0.0 }
 0x1a5   : > { %543 = vadd.xlane.f32.xlu2 %v542_v58 }
 0x1a8   : > { %v617_v61 = vpop.permute.xlu1 %616 }
 0x1a9   : > { %v627_v62 = vand.u32 %v1319_v53, %v617_v61  ;;  %v712_v61 = vld [vmem:[%s1427_s3 + $0xc] sm:$0xf] }
 0x1ab   : > { %636 = vmatpush.bf16.msrb.mxu0 %v627_v62 }
 0x1ad   : > { %546 = vadd.xlane.f32.xlu2 %v545_v60 }
 0x1c5   : > { %642 = vrot.lane.b32.xlu2 %v1296_v11, %s1216_s25  ;;  %s394_s25 = scalar_lea.vmem %s1426_s2, %s1082_s20 }
 0x208   : > { %v538_v63 = vpop.xlane.xlu2 %537 }
 0x209   : > { %1169 = vrcp.f32 %v538_v63  ;;  %v559_v7 = vand.u32 2147483648, %v538_v63  ;;  %v557_v8 = vand.u32 2147483647, %v538_v63  ;;  %vm553_vm5 = vweird.f32 %v538_v63 }
 0x20b   : > { %v560_v12 = vor.u32 1.1754944e-38, %v559_v7  ;;  %vm558_vm7 = vcmp.eq.f32.partialorder %v557_v8, 8.507059e+37 }
 0x20f   : > { %v1170_v0 = vpop.eup %1169 }
 0x210   : > { %v549_v1 = vmul.f32 %v1170_v0, %v538_v63  ;;  %v541_v2 = vpop.xlane.xlu2 %540  ;;  %vm554_vm4 = vweird.f32 %v1170_v0 }
 0x211   : > { %1171 = vrcp.f32 %v541_v2  ;;  %vm555_vm6 = vmor %vm553_vm5, %vm554_vm4  ;;  %v574_v19 = vand.u32 2147483648, %v541_v2  ;;  %v572_v20 = vand.u32 2147483647, %v541_v2  ;;  %vm568_vm10 = vweird.f32 %v541_v2 }
 0x212   : > { %v550_v4 = vsub.f32 1.0, %v549_v1 }
 0x213   : > { %v575_v25 = vor.u32 1.1754944e-38, %v574_v19  ;;  %vm573_vm12 = vcmp.eq.f32.partialorder %v572_v20, 8.507059e+37 }
 0x214   : > { %v551_v6 = vmul.f32 %v1170_v0, %v550_v4 }
 0x216   : > { %v552_v9 = vadd.f32 %v1170_v0, %v551_v6 }
 0x217   : > { %v1172_v10 = vpop.eup %1171 }
 0x218   : > { %v556_v11 = vsel %vm555_vm6, %v1170_v0, %v552_v9  ;;  %v564_v13 = vmul.f32 %v1172_v10, %v541_v2  ;;  %v544_v14 = vpop.xlane.xlu2 %543  ;;  %vm569_vm8 = vweird.f32 %v1172_v10 }
 0x219   : > { %1173 = vrcp.f32 %v544_v14  ;;  %v561_v16 = vsel %vm558_vm7, %v560_v12, %v556_v11  ;;  %vm570_vm11 = vmor %vm568_vm10, %vm569_vm8  ;;  %v589_v30 = vand.u32 2147483648, %v544_v14  ;;  %v587_v33 = vand.u32 2147483647, %v544_v14 }
 0x21a   : > { %v565_v15 = vsub.f32 1.0, %v564_v13  ;;  %v562_v17 = vmul.f32 %v1162_v42, %v561_v16  ;;  %vm583_vm14 = vweird.f32 %v544_v14  ;;  %vm716_vm7 = vcmask 1043456  }
 0x21b   : > { %v590_v36 = vor.u32 1.1754944e-38, %v589_v30  ;;  %vm588_vm2 = vcmp.eq.f32.partialorder %v587_v33, 8.507059e+37  ;;  %v718_v56 = vsel %vm716_vm7, %v709_v55, 0  ;;  %v775_v62 = vsel %vm716_vm7, %v712_v61, 0 }
 0x21c   : > { %v566_v18 = vmul.f32 %v1172_v10, %v565_v15  ;;  %608 = vst.msk [vmem:[%s1338_s29] sm:$0x1f] %vm511_vm1, %v562_v17  ;;  %v612_v21 = vpack.c.bf16 %v562_v17, %v562_v17  ;;  %727 = vmatpush.bf16.msra.mxu0 %v718_v56  ;;  %784 = vmatpush.bf16.msra.mxu3 %v775_v62 }
 0x21e   : > { %v567_v22 = vadd.f32 %v1172_v10, %v566_v18  ;;  %1090 = vmatmul.msk.bf16.vlgmr.msrb.gmra.mxu0 %vm618_vm9, %v612_v21 }
 0x21f   : > { %v1174_v23 = vpop.eup %1173 }
 0x220   : > { %v571_v24 = vsel %vm570_vm11, %v1172_v10, %v567_v22  ;;  %v579_v26 = vmul.f32 %v1174_v23, %v544_v14  ;;  %v547_v27 = vpop.xlane.xlu2 %546  ;;  %vm584_vm13 = vweird.f32 %v1174_v23 }
 0x221   : > { %1175 = vrcp.f32 %v547_v27  ;;  %v576_v29 = vsel %vm573_vm12, %v575_v25, %v571_v24  ;;  %vm585_vm15 = vmor %vm583_vm14, %vm584_vm13  ;;  %v602_v44 = vand.u32 2147483647, %v547_v27  ;;  %v604_v45 = vand.u32 2147483648, %v547_v27 }
 0x222   : > { %v580_v28 = vsub.f32 1.0, %v579_v26  ;;  %v577_v31 = vmul.f32 %v1315_v50, %v576_v29  ;;  %vm598_vm4 = vweird.f32 %v547_v27  ;;  %v803_v26 = vld [vmem:[%s394_s25] sm:$0x1f]  ;;  %vm868_vm12 = vcmask 261120  }
 0x223   : > { %v605_v50 = vor.u32 1.1754944e-38, %v604_v45  ;;  %vm603_vm6 = vcmp.eq.f32.partialorder %v602_v44, 8.507059e+37 }
 0x224   : > { %v581_v32 = vmul.f32 %v1174_v23, %v580_v28  ;;  %609 = vst.msk [vmem:[%s1338_s29 + $0x8] sm:$0x1f] %vm511_vm1, %v577_v31  ;;  %v613_v47 = vpack.c.bf16 %v577_v31, %v577_v31  ;;  %v1218_v31 = vmov 32.0  }
 0x225   : > { %1177 = vrcp.f32 %v1218_v31 }
 0x226   : > { %v582_v34 = vadd.f32 %v1174_v23, %v581_v32 }
 0x227   : > { %v1176_v35 = vpop.eup %1175 }
 0x228   : > { %v586_v37 = vsel %vm585_vm15, %v1174_v23, %v582_v34  ;;  %v594_v38 = vmul.f32 %v1176_v35, %v547_v27  ;;  %v643_v39 = vpop.permute.xlu2 %642  ;;  %vm599_vm3 = vweird.f32 %v1176_v35  ;;  %v1158_v23 = vld [vmem:[%s1428_s4] ss:$0 sm:$0xff] }
 0x229   : > { %v648_v40 = vand.u32 %v643_v39, %v1319_v53  ;;  %v591_v41 = vsel %vm588_vm2, %v590_v36, %v586_v37  ;;  %vm600_vm5 = vmor %vm598_vm4, %vm599_vm3  ;;  %vm943_vm3 = vcmask 523264  }
 0x22a   : > { %v595_v42 = vsub.f32 1.0, %v594_v38  ;;  %v592_v43 = vmul.f32 %v1322_v57, %v591_v41  ;;  %v711_v57 = vld [vmem:[%s1427_s3 + $0x8] sm:$0xf] }
 0x22b   : > { %657 = vmatpush.bf16.msrb.mxu1 %v648_v40  ;;  %v756_v58 = vsel %vm716_vm7, %v711_v57, 0  ;;  %v1178_v32 = vpop.eup %1177 }
 0x22c   : > { %v596_v46 = vmul.f32 %v1176_v35, %v595_v42  ;;  %610 = vst.msk [vmem:[%s1338_s29 + $0x10] sm:$0x1f] %vm511_vm1, %v592_v43  ;;  %v614_v48 = vpack.c.bf16 %v592_v43, %v592_v43  ;;  %765 = vmatpush.bf16.msra.mxu2 %v756_v58  ;;  %v809_v33 = vmul.f32 32.0, %v1178_v32  ;;  %v1219_v43 = vmov 31.0  }
 0x22d   : > { %1179 = vrcp.f32 %v1219_v43 }
 0x22e   : > { %v597_v49 = vadd.f32 %v1176_v35, %v596_v46  ;;  %1091 = vmatmul.msk.bf16.vlgmr.msrb.gmra.mxu1 %vm618_vm9, %v613_v47  ;;  %1092 = vmatmul.msk.bf16.vlgmr.msrb.gmra.mxu2 %vm618_vm9, %v614_v48  ;;  %v810_v34 = vsub.f32 1.0, %v809_v33  ;;  %v1129_v47 = vld [vmem:[%s1429_s5 + $0x8] sm:$0xff] }
 0x22f   : > { %878 = vmatpush.bf16.msrb.mxu0 %v1129_v47 }
 0x230   : > { %v601_v51 = vsel %vm600_vm5, %v1176_v35, %v597_v49  ;;  %v811_v35 = vmul.f32 %v1178_v32, %v810_v34  ;;  %v1128_v49 = vld [vmem:[%s1429_s5] sm:$0xff] }
 0x231   : > { %v606_v52 = vsel %vm603_vm6, %v605_v50, %v601_v51 }
 0x232   : > { %v607_v53 = vmul.f32 %v1326_v59, %v606_v52  ;;  %v710_v59 = vld [vmem:[%s1427_s3 + $0x4] sm:$0xf]  ;;  %v812_v36 = vadd.f32 %v1178_v32, %v811_v35 }
 0x233   : > { %v737_v60 = vsel %vm716_vm7, %v710_v59, 0  ;;  %v1180_v44 = vpop.eup %1179  ;;  %879 = vmatpush.bf16.msrb.mxu0 %v1128_v49  ;;  %v831_v59 = vstv %s1098_s30 }
 0x234   : > { %611 = vst.msk [vmem:[%s1338_s29 + $0x18] sm:$0x1f] %vm511_vm1, %v607_v53  ;;  %v615_v54 = vpack.c.bf16 %v607_v53, %v607_v53  ;;  %746 = vmatpush.bf16.msra.mxu1 %v737_v60  ;;  %vm790_vm1 = vcmask 258048   ;;  %v822_v45 = vmul.f32 31.0, %v1180_v44  ;;  %vm826_vm8 = vweird.f32 %v1180_v44  ;;  %s404_s29 = scalar_lea.vmem %s1434_s10, %s1082_s20 }
 0x236   : > { %1093 = vmatmul.msk.bf16.vlgmr.msrb.gmra.mxu3 %vm618_vm9, %v615_v54  ;;  %v823_v46 = vsub.f32 1.0, %v822_v45 }
 0x238   : > { %v824_v48 = vmul.f32 %v1180_v44, %v823_v46 }
 0x23a   : > { %v825_v50 = vadd.f32 %v1180_v44, %v824_v48 }
 0x23c   : > { %v827_v51 = vsel %vm826_vm8, %v1180_v44, %v825_v50 }
 0x29b   : > { %v638_v63 = vpop.f32.mrf.mxu0 }
 0x29c   : > { %v705_v0 = vpack.c.bf16 %v638_v63, %v638_v63  ;;  %v845_v63 = vstv %s829_s11 }
 0x29e   : > { %1094 = vmatmul.msk.bf16.vlgmr.msra.gmra.mxu0 %vm415_vm0, %v705_v0 }
 0x2a3   : > { %v640_v1 = vpop.f32.mrf.mxu0 }
 0x2ab   : > { %v659_v2 = vpop.f32.mrf.mxu1 }
 0x2ac   : > { %v706_v3 = vpack.c.bf16 %v659_v2, %v659_v2 }
 0x2ae   : > { %1095 = vmatmul.msk.bf16.vlgmr.msra.gmra.mxu1 %vm415_vm0, %v706_v3 }
 0x2b1   : > { %v680_v4 = vpop.f32.mrf.mxu2 }
 0x2b2   : > { %v707_v5 = vpack.c.bf16 %v680_v4, %v680_v4  ;;  %v1133_v4 = vld [vmem:[%s1431_s7 + $0x18] sm:$0xff] }
 0x2b3   : > { %v661_v6 = vpop.f32.mrf.mxu1  ;;  %951 = vmatpush.bf16.msrb.mxu1 %v1133_v4 }
 0x2b4   : > { %1096 = vmatmul.msk.bf16.vlgmr.msra.gmra.mxu2 %vm415_vm0, %v707_v5  ;;  %v1132_v5 = vld [vmem:[%s1431_s7 + $0x10] sm:$0xff]  ;;  %v1159_v6 = vld [vmem:[%s1430_s6] ss:$0 sm:$0xff] }
 0x2b7   : > { %952 = vmatpush.bf16.msrb.mxu1 %v1132_v5 }
 0x2b9   : > { %v682_v7 = vpop.f32.mrf.mxu2  ;;  %v701_v8 = vpop.f32.mrf.mxu3 }
 0x2ba   : > { %v708_v9 = vpack.c.bf16 %v701_v8, %v701_v8  ;;  %v1131_v7 = vld [vmem:[%s1431_s7 + $0x8] sm:$0xff] }
 0x2bb   : > { %953 = vmatpush.bf16.msrb.mxu1 %v1131_v7 }
 0x2bc   : > { %1097 = vmatmul.msk.bf16.vlgmr.msra.gmra.mxu3 %vm415_vm0, %v708_v9  ;;  %vm813_vm0 = vweird.f32 %v1178_v32 }
 0x2bd   : > { %v814_v37 = vsel %vm813_vm0, %v1178_v32, %v812_v36 }
 0x2c1   : > { %v703_v10 = vpop.f32.mrf.mxu3 }
 0x2c2   : > { %v1130_v10 = vld [vmem:[%s1431_s7] sm:$0xff] }
 0x2c3   : > { %954 = vmatpush.bf16.msrb.mxu1 %v1130_v10 }
 0x31b   : > { %v729_v11 = vpop.f32.mrf.mxu0 }
 0x31c   : > { %v791_v17 = vsel %vm790_vm1, %v729_v11, 0.0 }
 0x323   : > { %v731_v12 = vpop.f32.mrf.mxu0 }
 0x32b   : > { %v748_v13 = vpop.f32.mrf.mxu1 }
 0x32c   : > { %v792_v16 = vsel %vm790_vm1, %v748_v13, 0.0 }
 0x32d   : > { %v793_v19 = vadd.f32 %v792_v16, %v791_v17 }
 0x333   : > { %v750_v14 = vpop.f32.mrf.mxu1 }
 0x337   : > { %v767_v15 = vpop.f32.mrf.mxu2 }
 0x338   : > { %v794_v18 = vsel %vm790_vm1, %v767_v15, 0.0 }
 0x339   : > { %v795_v20 = vadd.f32 %v794_v18, %v793_v19 }
 0x33f   : > { %v769_v21 = vpop.f32.mrf.mxu2  ;;  %v786_v22 = vpop.f32.mrf.mxu3 }
 0x340   : > { %v796_v24 = vsel %vm790_vm1, %v786_v22, 0.0 }
 0x341   : > { %v797_v25 = vadd.f32 %v796_v24, %v795_v20 }
 0x343   : > { %v802_v27 = vadd.f32 %v1158_v23, %v797_v25 }
 0x345   : > { %v804_v28 = vadd.f32 %v803_v26, %v802_v27 }
 0x347   : > { %v788_v29 = vpop.f32.mrf.mxu3  ;;  %v805_v30 = vsel %vm790_vm1, %v804_v28, 0.0 }
 0x348   : > { %806 = vadd.xlane.f32.xlu0 %v805_v30 }
 0x3bb   : > { %v807_v38 = vpop.xlane.xlu0 %806 }
 0x3bc   : > { %v815_v39 = vmul.f32 %v814_v37, %v807_v38 }
 0x3be   : > { %v816_v40 = vsub.f32 %v804_v28, %v815_v39  ;;  %v1160_v28 = vld [vmem:[%s1432_s8] ss:$0 sm:$0xff] }
 0x3c0   : > { %v817_v41 = vmul.f32 %v816_v40, %v816_v40  ;;  %v832_v62 = vmul.f32 %v831_v59, %v816_v40 }
 0x3c2   : > { %v818_v42 = vsel %vm790_vm1, %v817_v41, 0.0 }
 0x3c3   : > { %819 = vadd.xlane.f32.xlu2 %v818_v42 }
 0x436   : > { %v820_v52 = vpop.xlane.xlu2 %819 }
 0x437   : > { %v828_v53 = vmul.f32 %v827_v51, %v820_v52 }
 0x439   : > { %v833_v54 = vadd.f32 1e-05, %v828_v53 }
 0x43b   : > { %1181 = vrsqrt.f32 %v833_v54  ;;  %vm840_vm10 = vweird.f32 %v833_v54 }
 0x441   : > { %v1182_v55 = vpop.eup %1181 }
 0x442   : > { %v835_v56 = vmul.f32 %v1182_v55, %v833_v54  ;;  %vm841_vm9 = vweird.f32 %v1182_v55 }
 0x443   : > { %vm842_vm11 = vmor %vm840_vm10, %vm841_vm9 }
 0x444   : > { %v836_v57 = vmul.f32 %v1182_v55, %v835_v56 }
 0x446   : > { %v837_v58 = vmul.f32 0.5, %v836_v57 }
 0x448   : > { %v838_v60 = vsub.f32 1.5, %v837_v58 }
 0x44a   : > { %v839_v61 = vmul.f32 %v1182_v55, %v838_v60 }
 0x44c   : > { %v843_v0 = vsel %vm842_vm11, %v1182_v55, %v839_v61 }
 0x44d   : > { %v844_v1 = vmul.f32 %v843_v0, %v832_v62 }
 0x44f   : > { %v846_v2 = vadd.f32 %v845_v63, %v844_v1 }
 0x451   : > { %v847_v3 = vpack.c.bf16 %v846_v2, %v846_v2 }
 0x453   : > { %1107 = vmatmul.msk.bf16.vlgmr.msrb.gmra.mxu0 %vm868_vm12, %v847_v3 }
 0x4d0   : > { %v881_v8 = vpop.f32.mrf.mxu0 }
 0x4d1   : > { %v882_v9 = vadd.f32 %v1159_v6, %v881_v8 }
 0x4d3   : > { %v1108_v11 = vmul.f32 -1.702, %v882_v9 }
 0x4d5   : > { %v887_v12 = vmul.f32 1.442695, %v1108_v11 }
 0x4d7   : > { %1183 = vpow2.f32 %v887_v12 }
 0x4d8   : > { %v883_v13 = vpop.f32.mrf.mxu0 }
 0x4dd   : > { %v1184_v14 = vpop.eup %1183 }
 0x4de   : > { %v889_v15 = vadd.f32 1.0, %v1184_v14 }
 0x4e0   : > { %1185 = vrcp.f32 %v889_v15  ;;  %v901_v19 = vand.u32 2147483648, %v889_v15  ;;  %v899_v21 = vand.u32 2147483647, %v889_v15  ;;  %vm895_vm14 = vweird.f32 %v889_v15 }
 0x4e2   : > { %v902_v23 = vor.u32 1.1754944e-38, %v901_v19  ;;  %vm900_vm2 = vcmp.eq.f32.partialorder %v899_v21, 8.507059e+37 }
 0x4e6   : > { %v1186_v16 = vpop.eup %1185 }
 0x4e7   : > { %v891_v17 = vmul.f32 %v1186_v16, %v889_v15  ;;  %vm896_vm13 = vweird.f32 %v1186_v16 }
 0x4e8   : > { %vm897_vm15 = vmor %vm895_vm14, %vm896_vm13 }
 0x4e9   : > { %v892_v18 = vsub.f32 1.0, %v891_v17 }
 0x4eb   : > { %v893_v20 = vmul.f32 %v1186_v16, %v892_v18 }
 0x4ed   : > { %v894_v22 = vadd.f32 %v1186_v16, %v893_v20 }
 0x4ef   : > { %v898_v24 = vsel %vm897_vm15, %v1186_v16, %v894_v22 }
 0x4f0   : > { %v903_v25 = vsel %vm900_vm2, %v902_v23, %v898_v24 }
 0x4f1   : > { %v905_v26 = vmul.f32 %v903_v25, %v882_v9 }
 0x4f3   : > { %v906_v27 = vpack.c.bf16 %v905_v26, %v905_v26 }
 0x4f5   : > { %1125 = vmatmul.msk.bf16.vlgmr.msrb.gmra.mxu1 %vm943_vm3, %v906_v27 }
 0x572   : > { %v956_v29 = vpop.f32.mrf.mxu1 }
 0x573   : > { %v957_v30 = vadd.f32 %v1160_v28, %v956_v29 }
 0x575   : > { %v960_v31 = vadd.f32 %v957_v30, %v846_v2 }
 0x577   : > { %961 = vst.msk [vmem:[%s404_s29] sm:$0x1f] %vm790_vm1, %v960_v31 }
 0x57a   : > { %v958_v32 = vpop.f32.mrf.mxu1 }
 0x57b PF: > { %s22_s13 = sadd.s32 1, %s1212_s13  }
 0x57c   : > { %p19_p8 = scmp.ge.s32.totalorder %s22_s13, 4  }
 0x57e   :  { %21 = sbr.rel (!%p19_p8) target bundleno = 1 (0x1), region = 106 }
 0x583   :  { %998 = vsyncpa [#allocation3], 1 }
 0x584   :  { %1000 = vsyncpa [#allocation3 + $0x1], 1 }

</bundles_post_ra>
